<compile_context>
chip_gen: v7x
topology: tpu7x:2x2x1
jax: 0.10.0
libtpu: 0.0.40
codegen_flags: <defaults>
</compile_context>

<pallas_src>
import functools

import jax
import jax.numpy as jnp
from jax import lax
from jax.experimental import pallas as pl
from jax.experimental.pallas import tpu as pltpu


HIDDEN = 32          # fc1 / fc2 width
LANE_PAD = 128       # lane-dense width for every layer output and the result
MAX_BATCH_TILE = 1024


def _round_up(n, m):
    return ((n + m - 1) // m) * m


# --------------------------------------------------------------------------- #
# Kernel
# --------------------------------------------------------------------------- #
def policy_mlp_kernel(x_ref, w_ref, o_ref, *, action_size):
    """One batch tile of the MLP.

    x_ref : (TB, in_pad) bf16 — flattened observations; column `in_dim` holds a
            constant 1.0 (bias lane), remaining pad columns are zero.
    w_ref : (in_pad + 2*128, 128) bf16 packed slab, rows:
              [0, in_pad)              : W1ext (bias row + constant-carry column)
              [in_pad, in_pad+128)     : W2ext
              [in_pad+128, in_pad+256) : W3ext
            Zero padding makes padded lanes/rows contribute exactly 0.
    o_ref : (TB, 128) f32 — softmax probs in lanes [0, action_size), 0 elsewhere.
    """
    in_pad = x_ref.shape[1]
    off_w2 = in_pad
    off_w3 = in_pad + LANE_PAD

    x = x_ref[...]                                    # (TB, in_pad) bf16
    w1 = w_ref[0:off_w2, :]                           # (in_pad, 128) bf16
    w2 = w_ref[off_w2:off_w3, :]                      # (128, 128)   bf16
    w3 = w_ref[off_w3:off_w3 + LANE_PAD, :]           # (128, 128)   bf16

    # Biases are folded in via the constant-1 lane, so each layer is a pure dot.
    h1 = jnp.maximum(jnp.dot(x, w1, preferred_element_type=jnp.float32), 0.0)
    h1 = h1.astype(jnp.bfloat16)
    h2 = jnp.maximum(jnp.dot(h1, w2, preferred_element_type=jnp.float32), 0.0)
    h2 = h2.astype(jnp.bfloat16)
    logits = jnp.dot(h2, w3, preferred_element_type=jnp.float32)   # (TB, 128) f32

    # Softmax over the first `action_size` lanes only (rest is padding).
    lane = lax.broadcasted_iota(jnp.int32, logits.shape, 1)
    valid = lane < action_size
    masked = jnp.where(valid, logits, -1e30)
    m = jnp.max(masked, axis=-1, keepdims=True)
    e = jnp.exp(masked - m)                           # padded lanes -> 0
    denom = jnp.sum(e, axis=-1, keepdims=True)
    # Exact division: downstream RL code samples / takes log-probs.
    o_ref[...] = (e / denom).astype(o_ref.dtype)


# --------------------------------------------------------------------------- #
# Parameter packing (bias-folded, bf16)
# --------------------------------------------------------------------------- #
def pack_params(params, *, in_dim, action_size):
    """Pack (w1,b1,w2,b2,w3,b3) — weights stored as (fan_in, fan_out) = torch
    weight.T — into a single zero-padded bf16 slab of shape
    (in_pad + 2*128, 128), with biases folded in via a constant-1 lane."""
    w1, b1, w2, b2, w3, b3 = params
    in_pad = _round_up(in_dim + 1, 16)        # +1 for the constant-1 bias lane
    rows = in_pad + 2 * LANE_PAD
    slab = jnp.zeros((rows, LANE_PAD), jnp.float32)

    # W1ext: real weights, bias row at `in_dim`, constant-carry column HIDDEN.
    slab = slab.at[:in_dim, :HIDDEN].set(w1.astype(jnp.float32))
    slab = slab.at[in_dim, :HIDDEN].set(b1.reshape(-1).astype(jnp.float32))
    slab = slab.at[in_dim, HIDDEN].set(1.0)          # h1[:, 32] == 1.0

    # W2ext.
    off = in_pad
    slab = slab.at[off:off + HIDDEN, :HIDDEN].set(w2.astype(jnp.float32))
    slab = slab.at[off + HIDDEN, :HIDDEN].set(b2.reshape(-1).astype(jnp.float32))
    slab = slab.at[off + HIDDEN, HIDDEN].set(1.0)    # h2[:, 32] == 1.0

    # W3ext.
    off = in_pad + LANE_PAD
    slab = slab.at[off:off + HIDDEN, :action_size].set(w3.astype(jnp.float32))
    slab = slab.at[off + HIDDEN, :action_size].set(b3.reshape(-1).astype(jnp.float32))

    return slab.astype(jnp.bfloat16)


def packed_in_pad(w_slab):
    return w_slab.shape[0] - 2 * LANE_PAD


# --------------------------------------------------------------------------- #
# Host-side helpers
# --------------------------------------------------------------------------- #
def _choose_batch_tile(B, max_tile=MAX_BATCH_TILE):
    """Keep >= 2 grid steps (v7x megacore) once there is a real batch, round to
    the bf16 sublane multiple (16), cap the tile size."""
    half = _round_up(max((B + 1) // 2, 1), 16)
    return max(16, min(max_tile, half))


def pad_observations(xb, *, in_dim, in_pad, b_pad):
    """(B, in_dim) f32 -> (b_pad, in_pad) bf16 with a constant-1 lane at column
    `in_dim`.  Do this once per rollout buffer, outside the hot path."""
    B = xb.shape[0]
    x = jnp.concatenate(
        [xb.astype(jnp.float32), jnp.ones((B, 1), jnp.float32)], axis=1)
    x = jnp.pad(x, ((0, b_pad - B), (0, in_pad - in_dim - 1)))
    return x.astype(jnp.bfloat16)


@functools.partial(jax.jit, static_argnames=("action_size", "batch_tile"))
def policy_forward_prepadded(x_pad, w_slab, *, action_size, batch_tile):
    """Hot path: x_pad is already (b_pad, in_pad) bf16 with the constant lane.
    Returns the padded (b_pad, 128) f32 probability block."""
    b_pad, in_pad = x_pad.shape
    assert b_pad % batch_tile == 0
    grid = b_pad // batch_tile

    return pl.pallas_call(
        functools.partial(policy_mlp_kernel, action_size=action_size),
        out_shape=jax.ShapeDtypeStruct((b_pad, LANE_PAD), jnp.float32),
        grid=(grid,),
        in_specs=[
            pl.BlockSpec((batch_tile, in_pad), lambda i: (i, 0)),
            # Same block every step -> weight slab DMA'd once, resident in VMEM.
            pl.BlockSpec(w_slab.shape, lambda i: (0, 0)),
        ],
        out_specs=pl.BlockSpec((batch_tile, LANE_PAD), lambda i: (i, 0)),
        compiler_params=pltpu.CompilerParams(
            dimension_semantics=("parallel",)),   # batch tiles shard across TCs (v7x)
    )(x_pad, w_slab)


def policy_network_forward_batched(xb, w_slab, *, in_dim, action_size,
                                   max_batch_tile=MAX_BATCH_TILE,
                                   return_padded=False):
    """xb: (B, in_dim) float32.  Returns (B, action_size) softmax probabilities,
    or the raw (b_pad, 128) block if return_padded=True (skips the slice pass)."""
    B = xb.shape[0]
    in_pad = packed_in_pad(w_slab)
    tb = _choose_batch_tile(B, max_batch_tile)
    b_pad = _round_up(B, tb)
    x_pad = pad_observations(xb, in_dim=in_dim, in_pad=in_pad, b_pad=b_pad)
    out = policy_forward_prepadded(x_pad, w_slab,
                                   action_size=action_size, batch_tile=tb)
    if return_padded:
        return out
    return out[:B, :action_size]


def policy_network_forward(x, w_slab, *, in_dim, action_size):
    """Exact torch module semantics for one observation: x.view(-1) -> MLP ->
    softmax.  Returns shape (action_size,)."""
    x_flat = x.reshape(1, -1).astype(jnp.float32)
    assert x_flat.shape[1] == in_dim, "flattened input must equal state_size*2"
    return policy_network_forward_batched(
        x_flat, w_slab, in_dim=in_dim, action_size=action_size)[0]


# --------------------------------------------------------------------------- #
# Init + reference
# --------------------------------------------------------------------------- #
def init_params(key, state_size, action_size):
    """Deterministic init mimicking nn.Linear default (uniform +/- 1/sqrt(fan_in)).
    Weights stored as (fan_in, fan_out) = PyTorch weight.T."""
    in_dim = state_size * 2

    def linear(key, fan_in, fan_out):
        kw, kb = jax.random.split(key)
        bound = 1.0 / jnp.sqrt(jnp.float32(fan_in))
        w = jax.random.uniform(kw, (fan_in, fan_out), jnp.float32, -bound, bound)
        b = jax.random.uniform(kb, (1, fan_out), jnp.float32, -bound, bound)
        return w, b

    k1, k2, k3 = jax.random.split(key, 3)
    w1, b1 = linear(k1, in_dim, HIDDEN)
    w2, b2 = linear(k2, HIDDEN, HIDDEN)
    w3, b3 = linear(k3, HIDDEN, action_size)
    return (w1, b1, w2, b2, w3, b3)


def _reference_forward(xb, params):
    w1, b1, w2, b2, w3, b3 = params
    h1 = jnp.maximum(xb @ w1 + b1.reshape(1, -1), 0.0)
    h2 = jnp.maximum(h1 @ w2 + b2.reshape(1, -1), 0.0)
    return jax.nn.softmax(h2 @ w3 + b3.reshape(1, -1), axis=-1)


# --------------------------------------------------------------------------- #
# Demo / self-test
# --------------------------------------------------------------------------- #
if __name__ == "__main__":
    # Source env: gym-anytrading stocks-v0, window_size = state_size = 30,
    # actions = {Sell, Buy}.
    state_size = 30
    action_size = 2
    in_dim = state_size * 2

    key = jax.random.PRNGKey(0)
    k_params, k_x, k_xb = jax.random.split(key, 3)

    params = init_params(k_params, state_size, action_size)
    w_slab = pack_params(params, in_dim=in_dim, action_size=action_size)

    # 1) Single observation (exact torch module semantics).
    x = jax.random.normal(k_x, (state_size, 2), dtype=jnp.float32)
    probs = policy_network_forward(x, w_slab, in_dim=in_dim, action_size=action_size)
    probs = jax.block_until_ready(probs)

    # 2) Batched throughput path: 256 observations -> tile 128, grid 2
    #    (>= 2 tiles so the parallel axis can use both v7x TensorCores).
    B = 256
    xb = jax.random.normal(k_xb, (B, in_dim), dtype=jnp.float32)
    probs_b = policy_network_forward_batched(
        xb, w_slab, in_dim=in_dim, action_size=action_size)
    probs_b = jax.block_until_ready(probs_b)

    # 3) Pre-padded hot path (what an RL rollout loop should call): pad once,
    #    no per-call pad/slice copies around the kernel.
    tb = _choose_batch_tile(B)
    x_prepad = pad_observations(xb, in_dim=in_dim, in_pad=packed_in_pad(w_slab),
                                b_pad=_round_up(B, tb))
    probs_pad = policy_forward_prepadded(x_prepad, w_slab,
                                         action_size=action_size, batch_tile=tb)
    probs_pad = jax.block_until_ready(probs_pad)

    # Correctness vs. plain-JAX f32 reference (tolerance covers bf16 weights/acts).
    ref_single = _reference_forward(x.reshape(1, -1), params)[0]
    ref_batch = _reference_forward(xb, params)

    assert probs.shape == (action_size,)
    assert probs_b.shape == (B, action_size)
    assert probs_pad.shape == (_round_up(B, tb), LANE_PAD)
    assert bool(jnp.isfinite(probs).all()) and bool(jnp.isfinite(probs_b).all())
    assert float(jnp.max(jnp.abs(probs - ref_single))) < 2e-2
    assert float(jnp.max(jnp.abs(probs_b - ref_batch))) < 2e-2
    assert float(jnp.max(jnp.abs(probs_pad[:B, :action_size] - ref_batch))) < 2e-2
    # Exact-division softmax: rows sum to 1 up to f32 rounding.
    assert float(jnp.max(jnp.abs(jnp.sum(probs_b, axis=-1) - 1.0))) < 1e-3

    print("KERNEL_OK")
</pallas_src>

<mosaic_0001>
module attributes {stable_mosaic.version = 11 : i64} {
  func.func @policy_mlp_kernel(%arg0: i32, %arg1: memref<16x64xbf16, #tpu.memory_space<vmem>>, %arg2: memref<320x128xbf16, #tpu.memory_space<vmem>>, %arg3: memref<16x128xf32, #tpu.memory_space<vmem>>) attributes {dimension_semantics = [#tpu.dimension_semantics<parallel>], iteration_bounds = array<i64: 1>, scalar_prefetch = 0 : i64, scratch_operands = 0 : i64, tpu.core_type = #tpu.core_type<tc>, window_params = [{transform_indices = @transform_0, window_bounds = array<i64: 16, 64>}, {pipeline_mode = #tpu.pipeline_mode<synchronous>, transform_indices = @transform_1, window_bounds = array<i64: 320, 128>}, {transform_indices = @transform_2, window_bounds = array<i64: 16, 128>}]} {
    %c0 = arith.constant 0 : index
    %c0_0 = arith.constant 0 : index
    %0 = vector.load %arg1[%c0, %c0_0] : memref<16x64xbf16, #tpu.memory_space<vmem>>, vector<16x64xbf16>
    %c0_1 = arith.constant 0 : index
    %c0_2 = arith.constant 0 : index
    %1 = vector.load %arg2[%c0_1, %c0_2] : memref<320x128xbf16, #tpu.memory_space<vmem>>, vector<64x128xbf16>
    %c64 = arith.constant 64 : index
    %c0_3 = arith.constant 0 : index
    %2 = vector.load %arg2[%c64, %c0_3] : memref<320x128xbf16, #tpu.memory_space<vmem>>, vector<128x128xbf16>
    %c192 = arith.constant 192 : index
    %c0_4 = arith.constant 0 : index
    %3 = vector.load %arg2[%c192, %c0_4] : memref<320x128xbf16, #tpu.memory_space<vmem>>, vector<128x128xbf16>
    %cst = arith.constant dense<0.000000e+00> : vector<16x128xf32>
    %4 = tpu.matmul %0, %1, %cst {dimension_numbers = #tpu.dot_dimension_numbers<[1], [0], [0], [1], [0, 0, 1, 1], [], []>} : vector<16x64xbf16>, vector<64x128xbf16>, vector<16x128xf32> -> vector<16x128xf32>
    %cst_5 = arith.constant 0.000000e+00 : f32
    %5 = vector.broadcast %cst_5 : f32 to vector<16x128xf32>
    %6 = arith.maximumf %4, %5 : vector<16x128xf32>
    %7 = arith.truncf %6 : vector<16x128xf32> to vector<16x128xbf16>
    %cst_6 = arith.constant dense<0.000000e+00> : vector<16x128xf32>
    %8 = tpu.matmul %7, %2, %cst_6 {dimension_numbers = #tpu.dot_dimension_numbers<[1], [0], [0], [1], [0, 0, 1, 1], [], []>} : vector<16x128xbf16>, vector<128x128xbf16>, vector<16x128xf32> -> vector<16x128xf32>
    %cst_7 = arith.constant 0.000000e+00 : f32
    %9 = vector.broadcast %cst_7 : f32 to vector<16x128xf32>
    %10 = arith.maximumf %8, %9 : vector<16x128xf32>
    %11 = arith.truncf %10 : vector<16x128xf32> to vector<16x128xbf16>
    %cst_8 = arith.constant dense<0.000000e+00> : vector<16x128xf32>
    %12 = tpu.matmul %11, %3, %cst_8 {dimension_numbers = #tpu.dot_dimension_numbers<[1], [0], [0], [1], [0, 0, 1, 1], [], []>} : vector<16x128xbf16>, vector<128x128xbf16>, vector<16x128xf32> -> vector<16x128xf32>
    %13 = tpu.iota {dimensions = array<i32: 1>} : vector<16x128xi32>
    %c2_i32 = arith.constant 2 : i32
    %14 = vector.broadcast %c2_i32 : i32 to vector<16x128xi32>
    %15 = arith.cmpi slt, %13, %14 : vector<16x128xi32>
    %cst_9 = arith.constant -1.000000e+30 : f32
    %16 = vector.broadcast %cst_9 : f32 to vector<16x128xf32>
    %17 = arith.select %15, %12, %16 : vector<16x128xi1>, vector<16x128xf32>
    %cst_10 = arith.constant dense<0xFF800000> : vector<16xf32>
    %18 = vector.multi_reduction <maximumf>, %17, %cst_10 [1] : vector<16x128xf32> to vector<16xf32>
    %19 = vector.shape_cast %18 : vector<16xf32> to vector<16x1xf32>
    %20 = vector.broadcast %19 : vector<16x1xf32> to vector<16x128xf32>
    %21 = arith.subf %17, %20 : vector<16x128xf32>
    %22 = math.exp %21 : vector<16x128xf32>
    %cst_11 = arith.constant dense<0.000000e+00> : vector<16xf32>
    %23 = vector.multi_reduction <add>, %22, %cst_11 [1] : vector<16x128xf32> to vector<16xf32>
    %24 = vector.shape_cast %23 : vector<16xf32> to vector<16x1xf32>
    %25 = vector.broadcast %24 : vector<16x1xf32> to vector<16x128xf32>
    %26 = arith.divf %22, %25 : vector<16x128xf32>
    %c0_12 = arith.constant 0 : index
    %c0_13 = arith.constant 0 : index
    %27 = vector.load %arg3[%c0_12, %c0_13] : memref<16x128xf32, #tpu.memory_space<vmem>>, vector<16x128xf32>
    tpu.vector_store %arg3[%c0_12, %c0_13], %26 {strides = array<i32>} : memref<16x128xf32, #tpu.memory_space<vmem>>, vector<16x128xf32>,
    return
  }
  func.func @transform_0(%arg0: i32) -> (i32, i32) {
    %c0_i32 = arith.constant 0 : i32
    %c0_i32_0 = arith.constant 0 : i32
    return %arg0, %c0_i32 : i32, i32
  }
  func.func @transform_1(%arg0: i32) -> (i32, i32) {
    %c0_i32 = arith.constant 0 : i32
    %c0_i32_0 = arith.constant 0 : i32
    %c0_i32_1 = arith.constant 0 : i32
    return %c0_i32, %c0_i32_0 : i32, i32
  }
  func.func @transform_2(%arg0: i32) -> (i32, i32) {
    %c0_i32 = arith.constant 0 : i32
    %c0_i32_0 = arith.constant 0 : i32
    return %arg0, %c0_i32 : i32, i32
  }
}

</mosaic_0001>

<bundles_post_ra>
// kernel: policy_forward_prepadded.1
= control target key start
LH: loop header
LB: loop body
LE: loop exit
PB: predicated region body
PF: predicated region fallthrough
CT: control target
= control target key end

     0   :  { %7 = vsyncpa [#allocation3], 0  ;;  %s677_s0 = inlined_call_operand.hbm [shape: bf16[16,64], index: 0, kind: input, shape index: {}]   ;;  %s678_s1 = inlined_call_operand.hbm [shape: bf16[320,128], index: 1, kind: input, shape index: {}]   ;;  %s679_s2 = inlined_call_operand.hbm [shape: f32[16,128], index: 2, kind: output, shape index: {}]  }
   0x1   :  { %8 = vsyncpa [#allocation6], 0 }
   0x2   :  { %9 = vsyncpa [#allocation4], 0  ;;  %s591_s9 = smov [#allocation2]   ;;  %s519_s13 = scalar_lea.hbm %s677_s0, 128 }
   0x3   :  { %s15_s10 = sshll.u32 %s591_s9, 4  ;;  %p520_p0 = scmp.ne.s32.totalorder %s677_s0, %s519_s13  ;;  %s16_s10 = int_to_ptr.vmem [resolvable:$true] %s15_s10 }
   0x4   :  { %p523_p1 = scmp.lt.u32.totalorder %s519_s13, %s677_s0 }
   0x6   :  { %p525_p2 = pnand %p523_p1, %p520_p0 }
   0x8   :  { %528 = shalt.err (!%p525_p2)
}
   0x9   :  { %s529_s18 = scalar_lea.vmem %s16_s10, 128  ;;  %p534_p4 = scmp.lt.s32.totalorder %s16_s10, %s16_s10 }
   0xa   :  { %p530_p3 = scmp.ne.s32.totalorder %s16_s10, %s529_s18  ;;  %p535_p5 = scmp.lt.s32.totalorder %s529_s18, %s529_s18 }
   0xc   :  { %p536_p6 = por %p535_p5, %p534_p4 }
   0xe   :  { %p537_p7 = pnand %p536_p6, %p530_p3 }
  0x10   :  { %540 = shalt.err (!%p537_p7)
}
  0x11   :  { %s592_s19 = smov 64   ;;  %s593_s20 = smov 4  }
  0x12   :  { %21 = dma.hbm_to_vmem [thread:$0]  %s677_s0, 128, %s16_s10, [#allocation3], %s592_s19, %s592_s19, %s593_s20  }
  0x13   :  { %s594_s23 = smov [#allocation5]   ;;  %s541_s27 = scalar_lea.hbm %s678_s1, 2560 }
  0x14   :  { %s27_s24 = sshll.u32 %s594_s23, 4  ;;  %p542_p8 = scmp.ne.s32.totalorder %s678_s1, %s541_s27  ;;  %s28_s24 = int_to_ptr.vmem [resolvable:$true] %s27_s24 }
  0x15   :  { %p545_p9 = scmp.lt.u32.totalorder %s541_s27, %s678_s1 }
  0x17   :  { %p547_p10 = pnand %p545_p9, %p542_p8 }
  0x19   :  { %550 = shalt.err (!%p547_p10)
}
  0x1a   :  { %s551_s4 = scalar_lea.vmem %s28_s24, 2560  ;;  %p556_p12 = scmp.lt.s32.totalorder %s28_s24, %s28_s24 }
  0x1b   :  { %p552_p11 = scmp.ne.s32.totalorder %s28_s24, %s551_s4  ;;  %p557_p13 = scmp.lt.s32.totalorder %s551_s4, %s551_s4 }
  0x1d   :  { %p558_p0 = por %p557_p13, %p556_p12 }
  0x1f   :  { %p559_p1 = pnand %p558_p0, %p552_p11 }
  0x21   :  { %562 = shalt.err (!%p559_p1)
}
  0x22   :  { %33 = dma.hbm_to_vmem [thread:$0]  %s678_s1, 2560, %s28_s24, [#allocation6], %s592_s19, %s592_s19, %s593_s20  }
  0x23   :  { %585 = dma.done.wait [#allocation3], 128  }
  0x24   :  { %586 = vsyncadd [#allocation3], 4294967168 }
  0x25   :  { %587 = dma.done.wait [#allocation6], 2560  }
  0x26   :  { %588 = vsyncadd [#allocation6], 4294964736  ;;  %v595_v0 = vmov 0.0   ;;  %vm596_vm0 = vmmov 0   ;;  %v490_v1 = vld [vmem:[#allocation5] sm:$0xff]   ;;  %v491_v2 = vld [vmem:[#allocation5 + $0x8] sm:$0xff]   ;;  %v341_v36 = vlaneseq }
  0x27   :  { %429 = vmatprep.subr.bf16.mxu0 %v595_v0  ;;  %437 = vmatprep.mubr.msk.bf16.mxu0 %vm596_vm0, %v595_v0  ;;  %v495_v3 = vld [vmem:[#allocation5 + $0x20] sm:$0xff]   ;;  %v492_v4 = vld [vmem:[#allocation5 + $0x10] sm:$0xff]   ;;  %v496_v5 = vld [vmem:[#allocation5 + $0x28] sm:$0xff]   ;;  %vm112_vm1 = vcmask 523264   ;;  %s597_s1 = smov [#allocation7]  }
  0x28   :  { %441 = vmatprep.subr.bf16.mxu1 %v595_v0  ;;  %457 = vmatprep.mubr.msk.bf16.mxu1 %vm596_vm0, %v595_v0  ;;  %v493_v6 = vld [vmem:[#allocation5 + $0x18] sm:$0xff]   ;;  %v497_v7 = vld [vmem:[#allocation5 + $0x30] sm:$0xff]   ;;  %v499_v10 = vld [vmem:[#allocation5 + $0x40] sm:$0xff]   ;;  %v342_v37 = vand.u32 127, %v341_v36  ;;  %s371_s6 = sshll.u32 %s597_s1, 4  ;;  %s372_s6 = int_to_ptr.vmem [resolvable:$true] %s371_s6 }
  0x29   :  { %430 = vmatpush3.bf16.msra.mxu0 %v490_v1  ;;  %442 = vmatpush3.bf16.msra.mxu1 %v495_v3  ;;  %v494_v8 = vld [vmem:[#allocation2] sm:$0xff]   ;;  %v500_v11 = vld [vmem:[#allocation5 + $0x48] sm:$0xff]   ;;  %v501_v12 = vld [vmem:[#allocation5 + $0x50] sm:$0xff]   ;;  %s563_s7 = scalar_lea.vmem %s372_s6, 256  ;;  %p568_p3 = scmp.lt.s32.totalorder %s372_s6, %s372_s6 }
  0x2a   :  { %431 = vmatprep.subr.bf16.mxu0 %v595_v0  ;;  %443 = vmatprep.subr.bf16.mxu1 %v595_v0  ;;  %v498_v9 = vld [vmem:[#allocation5 + $0x38] sm:$0xff]   ;;  %v503_v14 = vld [vmem:[#allocation5 + $0x60] sm:$0xff]   ;;  %v504_v15 = vld [vmem:[#allocation5 + $0x68] sm:$0xff]   ;;  %vm343_vm2 = vcmp.lt.s32.totalorder %v342_v37, 2  ;;  %p564_p2 = scmp.ne.s32.totalorder %s372_s6, %s563_s7  ;;  %p569_p4 = scmp.lt.s32.totalorder %s563_s7, %s563_s7 }
  0x2b   :  { %v502_v13 = vld [vmem:[#allocation5 + $0x58] sm:$0xff]   ;;  %v505_v16 = vld [vmem:[#allocation5 + $0x70] sm:$0xff]   ;;  %v507_v18 = vld [vmem:[#allocation5 + $0x80] sm:$0xff]  }
  0x2c   :  { %v506_v17 = vld [vmem:[#allocation5 + $0x78] sm:$0xff]   ;;  %v508_v19 = vld [vmem:[#allocation5 + $0x88] sm:$0xff]   ;;  %v509_v27 = vld [vmem:[#allocation5 + $0x90] sm:$0xff]   ;;  %p570_p5 = por %p569_p4, %p568_p3 }
  0x2d   :  { %432 = vmatpush3.bf16.msra.mxu0 %v491_v2  ;;  %444 = vmatpush3.bf16.msra.mxu1 %v496_v5  ;;  %v510_v28 = vld [vmem:[#allocation5 + $0x98] sm:$0xff]  }
  0x2e   :  { %433 = vmatprep.subr.bf16.mxu0 %v595_v0  ;;  %445 = vmatprep.subr.bf16.mxu1 %v595_v0  ;;  %p571_p6 = pnand %p570_p5, %p564_p2 }
  0x31   :  { %434 = vmatpush3.bf16.msra.mxu0 %v492_v4  ;;  %446 = vmatpush3.bf16.msra.mxu1 %v497_v7 }
  0x32   :  { %435 = vmatprep.subr.bf16.mxu0 %v595_v0  ;;  %447 = vmatprep.subr.bf16.mxu1 %v595_v0 }
  0x35   :  { %436 = vmatpush3.bf16.msra.mxu0 %v493_v6  ;;  %448 = vmatpush3.bf16.msra.mxu1 %v498_v9 }
  0x36   :  { %461 = vmatprep.subr.bf16.mxu0 %v595_v0  ;;  %449 = vmatprep.subr.bf16.mxu1 %v595_v0 }
  0x38   :  { %438 = vmatmul.mubr.msk.bf16.vlgmr.msra.gmra.mrb[0].mxu0 %vm112_vm1, %v494_v8 }
  0x39   :  { %477 = vmatprep.mubr.msk.bf16.mxu0 %vm596_vm0, %v595_v0  ;;  %450 = vmatpush3.bf16.msra.mxu1 %v499_v10 }
  0x3a   :  { %451 = vmatprep.subr.bf16.mxu1 %v595_v0  ;;  %462 = vmatpush3.bf16.msra.mxu0 %v503_v14 }
  0x3b   :  { %463 = vmatprep.subr.bf16.mxu0 %v595_v0 }
  0x3d   :  { %452 = vmatpush3.bf16.msra.mxu1 %v500_v11 }
  0x3e   :  { %453 = vmatprep.subr.bf16.mxu1 %v595_v0  ;;  %464 = vmatpush3.bf16.msra.mxu0 %v504_v15 }
  0x3f   :  { %465 = vmatprep.subr.bf16.mxu0 %v595_v0 }
  0x41   :  { %454 = vmatpush3.bf16.msra.mxu1 %v501_v12 }
  0x42   :  { %455 = vmatprep.subr.bf16.mxu1 %v595_v0  ;;  %466 = vmatpush3.bf16.msra.mxu0 %v505_v16 }
  0x43   :  { %467 = vmatprep.subr.bf16.mxu0 %v595_v0 }
  0x45   :  { %456 = vmatpush3.bf16.msra.mxu1 %v502_v13 }
  0x46   :  { %468 = vmatpush3.bf16.msra.mxu0 %v506_v17 }
  0x47   :  { %469 = vmatprep.subr.bf16.mxu0 %v595_v0 }
  0x4a   :  { %470 = vmatpush3.bf16.msra.mxu0 %v507_v18 }
  0x4b   :  { %471 = vmatprep.subr.bf16.mxu0 %v595_v0 }
  0x4e   :  { %472 = vmatpush3.bf16.msra.mxu0 %v508_v19 }
  0x4f   :  { %473 = vmatprep.subr.bf16.mxu0 %v595_v0 }
  0x52   :  { %474 = vmatpush3.bf16.msra.mxu0 %v509_v27 }
  0x53   :  { %475 = vmatprep.subr.bf16.mxu0 %v595_v0 }
  0x56   :  { %476 = vmatpush3.bf16.msra.mxu0 %v510_v28 }
 0x10b   :  { %v150_v20 = vpop.f32.mrb[0].mxu0 }
 0x10c   :  { %v439_v21 = vpop.f32.mrb[1].mxu0  ;;  %v157_v23 = vmax.f32 %v150_v20, 0.0 }
 0x10d   :  { %v153_v22 = vpop.f32.mrb[2].mxu0 }
 0x10e   :  { %v158_v24 = vmax.f32 %v153_v22, 0.0  ;;  %v440_v25 = vpop.f32.mrb[3].mxu0 }
 0x110   :  { %v159_v26 = vpack.c.bf16 %v158_v24, %v157_v23 }
 0x112   :  { %458 = vmatmul.mubr.bf16.vlgmr.msra.gmra.mrb[0].mxu1 %v159_v26 }
 0x1e5   :  { %v242_v29 = vpop.f32.mrb[0].mxu1 }
 0x1e6   :  { %v459_v30 = vpop.f32.mrb[1].mxu1  ;;  %v249_v32 = vmax.f32 %v242_v29, 0.0 }
 0x1e7   :  { %v245_v31 = vpop.f32.mrb[2].mxu1 }
 0x1e8   :  { %v250_v33 = vmax.f32 %v245_v31, 0.0  ;;  %v460_v34 = vpop.f32.mrb[3].mxu1 }
 0x1ea   :  { %v251_v35 = vpack.c.bf16 %v250_v33, %v249_v32 }
 0x1ec   :  { %478 = vmatmul.mubr.bf16.vlgmr.msra.gmra.mrb[4].mxu0 %v251_v35 }
 0x2bf   :  { %v334_v38 = vpop.f32.mrb[4].mxu0 }
 0x2c0   :  { %v479_v39 = vpop.f32.mrb[5].mxu0  ;;  %v344_v40 = vsel %vm343_vm2, %v334_v38, -1e+30 }
 0x2c1   :  { %346 = vmax.xlane.f32.xlu0 %v344_v40  ;;  %v337_v41 = vpop.f32.mrb[6].mxu0 }
 0x2c2   :  { %v480_v42 = vpop.f32.mrb[7].mxu0  ;;  %v345_v43 = vsel %vm343_vm2, %v337_v41, -1e+30 }
 0x2c5   :  { %348 = vmax.xlane.f32.xlu0 %v345_v43 }
 0x34e   :  { %v347_v44 = vpop.xlane.xlu0 %346 }
 0x34f   :  { %v350_v45 = vsub.f32 %v344_v40, %v347_v44 }
 0x351   :  { %v352_v46 = vmul.f32 1.442695, %v350_v45 }
 0x352   :  { %v349_v47 = vpop.xlane.xlu0 %348 }
 0x353   :  { %511 = vpow2.f32 %v352_v46  ;;  %v351_v48 = vsub.f32 %v345_v43, %v349_v47 }
 0x355   :  { %v354_v49 = vmul.f32 1.442695, %v351_v48 }
 0x357   :  { %513 = vpow2.f32 %v354_v49 }
 0x35d   :  { %v512_v50 = vpop.eup %511 }
 0x35e   :  { %356 = vadd.xlane.f32.xlu1 %v512_v50 }
 0x361   :  { %v514_v51 = vpop.eup %513 }
 0x362   :  { %358 = vadd.xlane.f32.xlu1 %v514_v51 }
 0x3eb   :  { %v357_v52 = vpop.xlane.xlu1 %356 }
 0x3ec   :  { %515 = vrcp.f32 %v357_v52 }
 0x3ef   :  { %v359_v53 = vpop.xlane.xlu1 %358 }
 0x3f0   :  { %517 = vrcp.f32 %v359_v53 }
 0x3f6   :  { %v516_v54 = vpop.eup %515 }
 0x3f7   :  { %v361_v55 = vmul.f32 %v516_v54, %v512_v50 }
 0x3f9   :  { %364 = vst [vmem:[#allocation7] sm:$0xff] %v361_v55 }
 0x3fa   :  { %v518_v56 = vpop.eup %517 }
 0x3fb   :  { %v363_v57 = vmul.f32 %v518_v56, %v514_v51 }
 0x3fd   :  { %365 = vst [vmem:[#allocation7 + $0x8] sm:$0xff] %v363_v57 }
 0x3fe   :  { %574 = shalt.err (!%p571_p6)
}
 0x3ff   :  { %s575_s10 = scalar_lea.hbm %s679_s2, 256 }
 0x400   :  { %p576_p7 = scmp.ne.s32.totalorder %s679_s2, %s575_s10  ;;  %p579_p8 = scmp.lt.u32.totalorder %s575_s10, %s679_s2 }
 0x402   :  { %p581_p9 = pnand %p579_p8, %p576_p7 }
 0x404   :  { %584 = shalt.err (!%p581_p9)
}
 0x405   :  { %s598_s15 = smov 128   ;;  %s599_s16 = smov 8  }
 0x406   :  { %377 = dma.vmem_to_hbm [thread:$0]  %s372_s6, 256, %s679_s2, [#allocation4], %s598_s15, %s598_s15, %s599_s16  }
 0x407   :  { %589 = dma.done.wait [#allocation4], 256  }
 0x408   :  { %590 = vsyncadd [#allocation4], 4294967040 }
 0x409   :  { %381 = vsyncpa [#allocation3], 1 }
 0x40a   :  { %382 = vsyncpa [#allocation6], 1 }
 0x40b   :  { %383 = vsyncpa [#allocation4], 1 }

</bundles_post_ra>
